<compile_context>
chip_gen: v7x
topology: tpu7x:2x2x1
jax: 0.10.0
libtpu: 0.0.40
codegen_flags: <defaults>
</compile_context>

<pallas_src>
import numpy as np
import jax
import jax.numpy as jnp
from jax import lax
from jax.experimental import pallas as pl
from jax.experimental.pallas import tpu as pltpu

# ----------------------------- model hyper-params -----------------------------
INPUT_DIM = 8
HIDDEN_DIM = 32
OUTPUT_DIM = 4
HEADS = 4
HEAD_DIM = HIDDEN_DIM // HEADS          # GATConv(input, hidden//4, heads=4) -> concat = hidden
POOL_RATIO = 0.5

NUM_GRAPHS = 2
NODES_PER_GRAPH = 8
N = NUM_GRAPHS * NODES_PER_GRAPH        # 16 nodes total
K_PER_GRAPH = int(np.ceil(POOL_RATIO * NODES_PER_GRAPH))   # TopKPooling keep per graph

NEG_INF = -1e30

# ----------------------- packed parameter slab layout --------------------------
SLAB_COLS = 128                          # lane-dense

_slab_cursor = 0
def _slab_alloc(rows):
    """Reserve `rows` rows (start aligned to 8 sublanes); return start offset."""
    global _slab_cursor
    off = _slab_cursor
    _slab_cursor += -(-rows // 8) * 8
    return off

R_ADJ   = _slab_alloc(N)                 # [N, N]   GAT adjacency (+ self loops)
R_AHAT  = _slab_alloc(N)                 # [N, N]   D^-1/2 (A+I) D^-1/2
R_MEM   = _slab_alloc(NUM_GRAPHS)        # [G, N]   graph membership (one-hot rows)
R_HMASK = _slab_alloc(HEADS)             # [H, HID] per-head column mask
R_WGAT  = _slab_alloc(INPUT_DIM)         # [IN, HID]
R_WA    = _slab_alloc(INPUT_DIM)         # [IN, 2H] = W_gat @ [a_src | a_dst]
R_BGAT  = _slab_alloc(1)                 # [1, HID]
R_W1    = _slab_alloc(HIDDEN_DIM)        # [HID, HID]
R_B1    = _slab_alloc(1)                 # [1, HID]
R_W2E   = _slab_alloc(HIDDEN_DIM)        # [HID, HID+1]  (col HID = W2 @ p_unit)
R_B2E   = _slab_alloc(1)                 # [1, HID+1]
R_WFC   = _slab_alloc(HIDDEN_DIM)        # [HID, OUT]
R_BFC   = _slab_alloc(1)                 # [1, OUT]
R_SAME  = _slab_alloc(N)                 # [N, N]   same-graph mask
SLAB_ROWS = _slab_cursor                 # 208


# ------------------------------ fused Pallas kernel ----------------------------
def fused_gnn_kernel(x_ref, slab_ref, out_ref):
    f32 = jnp.float32
    x = x_ref[...]                                                   # [N, IN]

    # --- static views into the packed slab (free: static 8-aligned slices) ------
    adj       = slab_ref[R_ADJ:R_ADJ + N, 0:N]                       # [N, N]
    a_hat     = slab_ref[R_AHAT:R_AHAT + N, 0:N]                     # [N, N]
    member    = slab_ref[R_MEM:R_MEM + NUM_GRAPHS, 0:N]              # [G, N]
    head_mask = slab_ref[R_HMASK:R_HMASK + HEADS, 0:HIDDEN_DIM]      # [H, HID]
    w_gat     = slab_ref[R_WGAT:R_WGAT + INPUT_DIM, 0:HIDDEN_DIM]    # [IN, HID]
    wa        = slab_ref[R_WA:R_WA + INPUT_DIM, 0:2 * HEADS]         # [IN, 2H]
    b_gat     = slab_ref[R_BGAT:R_BGAT + 1, 0:HIDDEN_DIM]            # [1, HID]
    w_gcn1    = slab_ref[R_W1:R_W1 + HIDDEN_DIM, 0:HIDDEN_DIM]       # [HID, HID]
    b_gcn1    = slab_ref[R_B1:R_B1 + 1, 0:HIDDEN_DIM]                # [1, HID]
    w_gcn2e   = slab_ref[R_W2E:R_W2E + HIDDEN_DIM, 0:HIDDEN_DIM + 1] # [HID, HID+1]
    b_gcn2e   = slab_ref[R_B2E:R_B2E + 1, 0:HIDDEN_DIM + 1]          # [1, HID+1]
    w_fc      = slab_ref[R_WFC:R_WFC + HIDDEN_DIM, 0:OUTPUT_DIM]     # [HID, OUT]
    b_fc      = slab_ref[R_BFC:R_BFC + 1, 0:OUTPUT_DIM]              # [1, OUT]
    same      = slab_ref[R_SAME:R_SAME + N, 0:N]                     # [N, N]

    # ---------------- GATConv (4 heads, concat) + bias + fused ReLU -------------
    xw = jnp.dot(x, w_gat, preferred_element_type=f32)               # [N, HID]
    alpha = jnp.dot(x, wa, preferred_element_type=f32)               # [N, 2H] (src|dst)
    alpha_t = alpha.T                                                # [2H, N]
    a_s = alpha_t[0:HEADS, :]                                        # [H, N] source scores
    a_d = alpha_t[HEADS:2 * HEADS, :]                                # [H, N] target scores

    # e[h, i, j] = LeakyReLU(a_d[h, i] + a_s[h, j]); softmax over neighbours j
    e = a_d[:, :, None] + a_s[:, None, :]                            # [H, N, N]
    e = jnp.where(e > 0, e, 0.2 * e)                                 # LeakyReLU(0.2)
    e = jnp.where(adj[None, :, :] > 0, e, NEG_INF)
    e = e - jnp.max(e, axis=-1, keepdims=True)
    p = jnp.exp(e)                                                   # masked lanes -> 0.0
    attn = p * pl.reciprocal(jnp.sum(p, axis=-1, keepdims=True), approx=True)

    # pre-masked per-head value blocks (off the critical softmax chain)
    xw_blk = xw[None, :, :] * head_mask[:, None, :]                  # [H, N, HID]
    agg = jnp.einsum('hij,hjf->hif', attn, xw_blk,
                     preferred_element_type=f32)                     # [H, N, HID]
    h1 = jnp.sum(agg, axis=0) + b_gat                                # concat-heads result
    h1 = jnp.maximum(h1, 0.0)                                        # F.relu (dropout=id)

    # ---------------- GCN1 (+ReLU) and GCN2 (+ folded TopK score column) --------
    h2 = jnp.dot(a_hat, jnp.dot(h1, w_gcn1, preferred_element_type=f32),
                 preferred_element_type=f32) + b_gcn1
    h2 = jnp.maximum(h2, 0.0)
    h3e = jnp.dot(a_hat, jnp.dot(h2, w_gcn2e, preferred_element_type=f32),
                  preferred_element_type=f32) + b_gcn2e              # [N, HID+1]
    h3 = h3e[:, 0:HIDDEN_DIM]                                        # GCN2 output
    s_col = jnp.tanh(h3e[:, HIDDEN_DIM:HIDDEN_DIM + 1])              # [N, 1] tanh(h3 @ p/||p||)

    # ---------------- TopKPooling: fully parallel rank-based per-graph top-k ----
    s_row = s_col.T                                                  # [1, N]
    col_idx = lax.broadcasted_iota(jnp.int32, (N, N), 1)
    row_idx = lax.broadcasted_iota(jnp.int32, (N, N), 0)
    better = jnp.logical_or(s_row > s_col,
                            jnp.logical_and(s_row == s_col, col_idx < row_idx))
    outranked = jnp.where(jnp.logical_and(better, same > 0), 1.0, 0.0)
    rank = jnp.sum(outranked, axis=-1, keepdims=True)                # [N, 1]
    keep = jnp.where(rank < float(K_PER_GRAPH), 1.0, 0.0)            # top-K within own graph

    # gate kept nodes by tanh score, per-graph mean over the K kept nodes, final fc
    gate = keep * s_col                                              # [N, 1]
    pooled = jnp.dot(member, gate * h3,
                     preferred_element_type=f32) * (1.0 / K_PER_GRAPH)   # [G, HID]
    out_ref[...] = jnp.dot(pooled, w_fc, preferred_element_type=f32) + b_fc


# ------------------------------- forward wrapper -------------------------------
def spectral_gnn_forward(x, slab):
    vmem = pl.BlockSpec(memory_space=pltpu.MemorySpace.VMEM)
    return pl.pallas_call(
        fused_gnn_kernel,
        out_shape=jax.ShapeDtypeStruct((NUM_GRAPHS, OUTPUT_DIM), jnp.float32),
        in_specs=[vmem, vmem],
        out_specs=vmem,
    )(x, slab)


# --------------------------- host-side static preprocessing --------------------
def build_graph():
    """Two 8-node graphs: ring + chord edges (undirected/symmetric edge list)."""
    edges = []
    for g in range(NUM_GRAPHS):
        base = g * NODES_PER_GRAPH
        for i in range(NODES_PER_GRAPH):
            for step in (1, 2):
                j = (i + step) % NODES_PER_GRAPH
                edges.append((base + i, base + j))
                edges.append((base + j, base + i))
    edge_index = np.array(edges, dtype=np.int32).T                    # [2, E]
    adj = np.zeros((N, N), np.float32)
    adj[edge_index[1], edge_index[0]] = 1.0                           # adj[target, source]
    batch = np.repeat(np.arange(NUM_GRAPHS, dtype=np.int32), NODES_PER_GRAPH)
    edge_attr = np.ones((edge_index.shape[1], 1), np.float32)         # unused (edge_dim=None)
    return edge_index, edge_attr, batch, adj


def make_params_np(key):
    """Model parameters (numpy), with host-side algebraic folds applied."""
    ks = jax.random.split(key, 10)

    def rnd(k, shape, scale):
        return np.asarray(scale * jax.random.normal(k, shape, jnp.float32), np.float32)

    att_src = rnd(ks[0], (HEADS, HEAD_DIM), 0.2)
    att_dst = rnd(ks[1], (HEADS, HEAD_DIM), 0.2)
    # block-diagonal [HID, H] score matrices, then fold through W_gat:
    asrc = np.zeros((HIDDEN_DIM, HEADS), np.float32)
    adst = np.zeros((HIDDEN_DIM, HEADS), np.float32)
    for h in range(HEADS):
        asrc[h * HEAD_DIM:(h + 1) * HEAD_DIM, h] = att_src[h]
        adst[h * HEAD_DIM:(h + 1) * HEAD_DIM, h] = att_dst[h]
    w_gat = rnd(ks[2], (INPUT_DIM, HIDDEN_DIM), 0.2)
    wa = (w_gat @ np.concatenate([asrc, adst], axis=1)).astype(np.float32)   # [IN, 2H]
    b_gat = rnd(ks[3], (1, HIDDEN_DIM), 0.05)

    w_gcn1 = rnd(ks[4], (HIDDEN_DIM, HIDDEN_DIM), 0.2)
    b_gcn1 = rnd(ks[5], (1, HIDDEN_DIM), 0.05)
    w_gcn2 = rnd(ks[6], (HIDDEN_DIM, HIDDEN_DIM), 0.2)
    b_gcn2 = rnd(ks[7], (1, HIDDEN_DIM), 0.05)

    # TopKPooling scoring vector, normalized (PyG: tanh(x @ p / ||p||)) and folded
    # into GCN2 as an extra output column:  h3 @ p_unit == A_hat @ h2 @ (W2 @ p_unit) + b2 @ p_unit
    p_raw = rnd(ks[8], (HIDDEN_DIM, 1), 1.0)
    p_unit = (p_raw / np.sqrt((p_raw * p_raw).sum())).astype(np.float32)
    w_gcn2_ext = np.concatenate([w_gcn2, w_gcn2 @ p_unit], axis=1).astype(np.float32)
    b_gcn2_ext = np.concatenate([b_gcn2, b_gcn2 @ p_unit], axis=1).astype(np.float32)

    w_fc = rnd(ks[9], (HIDDEN_DIM, OUTPUT_DIM), 0.2)
    b_fc = np.zeros((1, OUTPUT_DIM), np.float32)
    return dict(w_gat=w_gat, wa=wa, b_gat=b_gat, w_gcn1=w_gcn1, b_gcn1=b_gcn1,
                w_gcn2_ext=w_gcn2_ext, b_gcn2_ext=b_gcn2_ext, w_fc=w_fc, b_fc=b_fc)


def build_slab(adj_np, batch_np, params):
    """Pack all static graph tensors + weights into one lane-dense f32 slab."""
    eye = np.eye(N, dtype=np.float32)
    adj_gat = np.clip(adj_np + eye, 0.0, 1.0)                 # GAT adds self-loops
    a_sl = adj_np + eye                                       # GCN: D^-1/2 (A+I) D^-1/2
    deg = a_sl.sum(axis=1)
    dinv = 1.0 / np.sqrt(deg)
    a_hat = (dinv[:, None] * a_sl * dinv[None, :]).astype(np.float32)
    member = (batch_np[None, :] == np.arange(NUM_GRAPHS)[:, None]).astype(np.float32)
    same = (batch_np[:, None] == batch_np[None, :]).astype(np.float32)
    head_mask = np.zeros((HEADS, HIDDEN_DIM), np.float32)
    for h in range(HEADS):
        head_mask[h, h * HEAD_DIM:(h + 1) * HEAD_DIM] = 1.0

    slab = np.zeros((SLAB_ROWS, SLAB_COLS), np.float32)

    def put(off, arr):
        arr = np.asarray(arr, np.float32)
        slab[off:off + arr.shape[0], 0:arr.shape[1]] = arr

    put(R_ADJ, adj_gat)
    put(R_AHAT, a_hat)
    put(R_MEM, member)
    put(R_HMASK, head_mask)
    put(R_WGAT, params["w_gat"])
    put(R_WA, params["wa"])
    put(R_BGAT, params["b_gat"])
    put(R_W1, params["w_gcn1"])
    put(R_B1, params["b_gcn1"])
    put(R_W2E, params["w_gcn2_ext"])
    put(R_B2E, params["b_gcn2_ext"])
    put(R_WFC, params["w_fc"])
    put(R_BFC, params["b_fc"])
    put(R_SAME, same)
    return slab


# ----------------------------------- main --------------------------------------
if __name__ == "__main__":
    key = jax.random.PRNGKey(0)
    k_x, k_p = jax.random.split(key)

    edge_index, edge_attr, batch, adj_np = build_graph()
    x = jax.random.normal(k_x, (N, INPUT_DIM), jnp.float32)

    params = make_params_np(k_p)
    slab = jnp.asarray(build_slab(adj_np, batch, params))     # single packed operand

    out = spectral_gnn_forward(x, slab)
    out = jax.block_until_ready(out)

    assert out.shape == (NUM_GRAPHS, OUTPUT_DIM)
    assert bool(jnp.all(jnp.isfinite(out)))
    print("KERNEL_OK")
</pallas_src>

<mosaic_0001>
module attributes {stable_mosaic.version = 11 : i64} {
  func.func @fused_gnn_kernel(%arg0: memref<16x8xf32, #tpu.memory_space<vmem>>, %arg1: memref<208x128xf32, #tpu.memory_space<vmem>>, %arg2: memref<2x4xf32, #tpu.memory_space<vmem>>) attributes {dimension_semantics = [], scalar_prefetch = 0 : i64, scratch_operands = 0 : i64, tpu.core_type = #tpu.core_type<tc>} {
    %c0 = arith.constant 0 : index
    %c0_0 = arith.constant 0 : index
    %0 = vector.load %arg0[%c0, %c0_0] : memref<16x8xf32, #tpu.memory_space<vmem>>, vector<16x8xf32>
    %c0_1 = arith.constant 0 : index
    %c0_2 = arith.constant 0 : index
    %1 = vector.load %arg1[%c0_1, %c0_2] : memref<208x128xf32, #tpu.memory_space<vmem>>, vector<16x16xf32>
    %c16 = arith.constant 16 : index
    %c0_3 = arith.constant 0 : index
    %2 = vector.load %arg1[%c16, %c0_3] : memref<208x128xf32, #tpu.memory_space<vmem>>, vector<16x16xf32>
    %c32 = arith.constant 32 : index
    %c0_4 = arith.constant 0 : index
    %3 = vector.load %arg1[%c32, %c0_4] : memref<208x128xf32, #tpu.memory_space<vmem>>, vector<2x16xf32>
    %c40 = arith.constant 40 : index
    %c0_5 = arith.constant 0 : index
    %4 = vector.load %arg1[%c40, %c0_5] : memref<208x128xf32, #tpu.memory_space<vmem>>, vector<4x32xf32>
    %c48 = arith.constant 48 : index
    %c0_6 = arith.constant 0 : index
    %5 = vector.load %arg1[%c48, %c0_6] : memref<208x128xf32, #tpu.memory_space<vmem>>, vector<8x32xf32>
    %c56 = arith.constant 56 : index
    %c0_7 = arith.constant 0 : index
    %6 = vector.load %arg1[%c56, %c0_7] : memref<208x128xf32, #tpu.memory_space<vmem>>, vector<8x8xf32>
    %c64 = arith.constant 64 : index
    %c0_8 = arith.constant 0 : index
    %7 = vector.load %arg1[%c64, %c0_8] : memref<208x128xf32, #tpu.memory_space<vmem>>, vector<1x32xf32>
    %c72 = arith.constant 72 : index
    %c0_9 = arith.constant 0 : index
    %8 = vector.load %arg1[%c72, %c0_9] : memref<208x128xf32, #tpu.memory_space<vmem>>, vector<32x32xf32>
    %c104 = arith.constant 104 : index
    %c0_10 = arith.constant 0 : index
    %9 = vector.load %arg1[%c104, %c0_10] : memref<208x128xf32, #tpu.memory_space<vmem>>, vector<1x32xf32>
    %c112 = arith.constant 112 : index
    %c0_11 = arith.constant 0 : index
    %10 = vector.load %arg1[%c112, %c0_11] : memref<208x128xf32, #tpu.memory_space<vmem>>, vector<32x33xf32>
    %c144 = arith.constant 144 : index
    %c0_12 = arith.constant 0 : index
    %11 = vector.load %arg1[%c144, %c0_12] : memref<208x128xf32, #tpu.memory_space<vmem>>, vector<1x33xf32>
    %c152 = arith.constant 152 : index
    %c0_13 = arith.constant 0 : index
    %12 = vector.load %arg1[%c152, %c0_13] : memref<208x128xf32, #tpu.memory_space<vmem>>, vector<32x4xf32>
    %c184 = arith.constant 184 : index
    %c0_14 = arith.constant 0 : index
    %13 = vector.load %arg1[%c184, %c0_14] : memref<208x128xf32, #tpu.memory_space<vmem>>, vector<1x4xf32>
    %c192 = arith.constant 192 : index
    %c0_15 = arith.constant 0 : index
    %14 = vector.load %arg1[%c192, %c0_15] : memref<208x128xf32, #tpu.memory_space<vmem>>, vector<16x16xf32>
    %cst = arith.constant dense<0.000000e+00> : vector<16x32xf32>
    %15 = tpu.matmul %0, %5, %cst {dimension_numbers = #tpu.dot_dimension_numbers<[1], [0], [0], [1], [0, 0, 1, 1], [], []>} : vector<16x8xf32>, vector<8x32xf32>, vector<16x32xf32> -> vector<16x32xf32>
    %cst_16 = arith.constant dense<0.000000e+00> : vector<16x8xf32>
    %16 = tpu.matmul %0, %6, %cst_16 {dimension_numbers = #tpu.dot_dimension_numbers<[1], [0], [0], [1], [0, 0, 1, 1], [], []>} : vector<16x8xf32>, vector<8x8xf32>, vector<16x8xf32> -> vector<16x8xf32>
    %17 = tpu.transpose %16, [1, 0] : vector<16x8xf32> -> vector<8x16xf32>
    %18 = vector.extract_strided_slice %17 {offsets = [0, 0], sizes = [4, 16], strides = [1, 1]} : vector<8x16xf32> to vector<4x16xf32>
    %19 = vector.extract_strided_slice %17 {offsets = [4, 0], sizes = [4, 16], strides = [1, 1]} : vector<8x16xf32> to vector<4x16xf32>
    %20 = vector.shape_cast %19 : vector<4x16xf32> to vector<4x16x1xf32>
    %21 = vector.shape_cast %18 : vector<4x16xf32> to vector<4x1x16xf32>
    %22 = vector.broadcast %20 : vector<4x16x1xf32> to vector<4x16x16xf32>
    %23 = vector.broadcast %21 : vector<4x1x16xf32> to vector<4x16x16xf32>
    %24 = arith.addf %22, %23 : vector<4x16x16xf32>
    %cst_17 = arith.constant 0.000000e+00 : f32
    %25 = vector.broadcast %cst_17 : f32 to vector<4x16x16xf32>
    %26 = arith.cmpf ogt, %24, %25 : vector<4x16x16xf32>
    %cst_18 = arith.constant 2.000000e-01 : f32
    %27 = vector.broadcast %cst_18 : f32 to vector<4x16x16xf32>
    %28 = arith.mulf %27, %24 : vector<4x16x16xf32>
    %29 = arith.select %26, %24, %28 : vector<4x16x16xi1>, vector<4x16x16xf32>
    %30 = vector.shape_cast %1 : vector<16x16xf32> to vector<1x16x16xf32>
    %cst_19 = arith.constant 0.000000e+00 : f32
    %31 = vector.broadcast %cst_19 : f32 to vector<1x16x16xf32>
    %32 = arith.cmpf ogt, %30, %31 : vector<1x16x16xf32>
    %cst_20 = arith.constant -1.000000e+30 : f32
    %33 = vector.shape_cast %32 : vector<1x16x16xi1> to vector<1x16x16xi1>
    %34 = vector.broadcast %33 : vector<1x16x16xi1> to vector<4x16x16xi1>
    %35 = vector.broadcast %cst_20 : f32 to vector<4x16x16xf32>
    %36 = arith.select %34, %29, %35 : vector<4x16x16xi1>, vector<4x16x16xf32>
    %cst_21 = arith.constant dense<0xFF800000> : vector<4x16xf32>
    %37 = vector.multi_reduction <maximumf>, %36, %cst_21 [2] : vector<4x16x16xf32> to vector<4x16xf32>
    %38 = vector.shape_cast %37 : vector<4x16xf32> to vector<4x16x1xf32>
    %39 = vector.broadcast %38 : vector<4x16x1xf32> to vector<4x16x16xf32>
    %40 = arith.subf %36, %39 : vector<4x16x16xf32>
    %41 = math.exp %40 : vector<4x16x16xf32>
    %cst_22 = arith.constant dense<0.000000e+00> : vector<4x16xf32>
    %42 = vector.multi_reduction <add>, %41, %cst_22 [2] : vector<4x16x16xf32> to vector<4x16xf32>
    %43 = vector.shape_cast %42 : vector<4x16xf32> to vector<4x16x1xf32>
    %44 = tpu.reciprocal %43 {approx = true} : vector<4x16x1xf32> -> vector<4x16x1xf32>
    %45 = vector.broadcast %44 : vector<4x16x1xf32> to vector<4x16x16xf32>
    %46 = arith.mulf %41, %45 : vector<4x16x16xf32>
    %47 = vector.shape_cast %15 : vector<16x32xf32> to vector<1x16x32xf32>
    %48 = vector.shape_cast %4 : vector<4x32xf32> to vector<4x1x32xf32>
    %49 = vector.broadcast %47 : vector<1x16x32xf32> to vector<4x16x32xf32>
    %50 = vector.broadcast %48 : vector<4x1x32xf32> to vector<4x16x32xf32>
    %51 = arith.mulf %49, %50 : vector<4x16x32xf32>
    "tpu.trace_start"() <{level = 10 : i32, message = "hij,hjf->hif"}> : () -> ()
    %cst_23 = arith.constant dense<0.000000e+00> : vector<4x16x32xf32>
    %52 = tpu.matmul %46, %51, %cst_23 {dimension_numbers = #tpu.dot_dimension_numbers<[2], [1], [1], [2], [0, 0, 0, 1, 1, 2], [0], [0]>} : vector<4x16x16xf32>, vector<4x16x32xf32>, vector<4x16x32xf32> -> vector<4x16x32xf32>
    "tpu.trace_stop"() : () -> ()
    %cst_24 = arith.constant dense<0.000000e+00> : vector<16x32xf32>
    %53 = vector.multi_reduction <add>, %52, %cst_24 [0] : vector<4x16x32xf32> to vector<16x32xf32>
    %54 = vector.broadcast %7 : vector<1x32xf32> to vector<16x32xf32>
    %55 = arith.addf %53, %54 : vector<16x32xf32>
    %cst_25 = arith.constant 0.000000e+00 : f32
    %56 = vector.broadcast %cst_25 : f32 to vector<16x32xf32>
    %57 = arith.maximumf %55, %56 : vector<16x32xf32>
    %cst_26 = arith.constant dense<0.000000e+00> : vector<16x32xf32>
    %58 = tpu.matmul %57, %8, %cst_26 {dimension_numbers = #tpu.dot_dimension_numbers<[1], [0], [0], [1], [0, 0, 1, 1], [], []>} : vector<16x32xf32>, vector<32x32xf32>, vector<16x32xf32> -> vector<16x32xf32>
    %cst_27 = arith.constant dense<0.000000e+00> : vector<16x32xf32>
    %59 = tpu.matmul %2, %58, %cst_27 {dimension_numbers = #tpu.dot_dimension_numbers<[1], [0], [0], [1], [0, 0, 1, 1], [], []>} : vector<16x16xf32>, vector<16x32xf32>, vector<16x32xf32> -> vector<16x32xf32>
    %60 = vector.broadcast %9 : vector<1x32xf32> to vector<16x32xf32>
    %61 = arith.addf %59, %60 : vector<16x32xf32>
    %cst_28 = arith.constant 0.000000e+00 : f32
    %62 = vector.broadcast %cst_28 : f32 to vector<16x32xf32>
    %63 = arith.maximumf %61, %62 : vector<16x32xf32>
    %cst_29 = arith.constant dense<0.000000e+00> : vector<16x33xf32>
    %64 = tpu.matmul %63, %10, %cst_29 {dimension_numbers = #tpu.dot_dimension_numbers<[1], [0], [0], [1], [0, 0, 1, 1], [], []>} : vector<16x32xf32>, vector<32x33xf32>, vector<16x33xf32> -> vector<16x33xf32>
    %cst_30 = arith.constant dense<0.000000e+00> : vector<16x33xf32>
    %65 = tpu.matmul %2, %64, %cst_30 {dimension_numbers = #tpu.dot_dimension_numbers<[1], [0], [0], [1], [0, 0, 1, 1], [], []>} : vector<16x16xf32>, vector<16x33xf32>, vector<16x33xf32> -> vector<16x33xf32>
    %66 = vector.broadcast %11 : vector<1x33xf32> to vector<16x33xf32>
    %67 = arith.addf %65, %66 : vector<16x33xf32>
    %68 = vector.extract_strided_slice %67 {offsets = [0, 0], sizes = [16, 32], strides = [1, 1]} : vector<16x33xf32> to vector<16x32xf32>
    %69 = vector.extract_strided_slice %67 {offsets = [0, 32], sizes = [16, 1], strides = [1, 1]} : vector<16x33xf32> to vector<16x1xf32>
    %70 = math.tanh %69 : vector<16x1xf32>
    %71 = tpu.transpose %70, [1, 0] : vector<16x1xf32> -> vector<1x16xf32>
    %72 = tpu.iota {dimensions = array<i32: 1>} : vector<16x16xi32>
    %73 = tpu.iota {dimensions = array<i32: 0>} : vector<16x16xi32>
    %74 = vector.broadcast %71 : vector<1x16xf32> to vector<16x16xf32>
    %75 = vector.broadcast %70 : vector<16x1xf32> to vector<16x16xf32>
    %76 = arith.cmpf ogt, %74, %75 : vector<16x16xf32>
    %77 = vector.broadcast %71 : vector<1x16xf32> to vector<16x16xf32>
    %78 = vector.broadcast %70 : vector<16x1xf32> to vector<16x16xf32>
    %79 = arith.cmpf oeq, %77, %78 : vector<16x16xf32>
    %80 = arith.cmpi slt, %72, %73 : vector<16x16xi32>
    %81 = arith.andi %79, %80 : vector<16x16xi1>
    %82 = arith.ori %76, %81 : vector<16x16xi1>
    %cst_31 = arith.constant 0.000000e+00 : f32
    %83 = vector.broadcast %cst_31 : f32 to vector<16x16xf32>
    %84 = arith.cmpf ogt, %14, %83 : vector<16x16xf32>
    %85 = arith.andi %82, %84 : vector<16x16xi1>
    %cst_32 = arith.constant 1.000000e+00 : f32
    %cst_33 = arith.constant 0.000000e+00 : f32
    %86 = vector.broadcast %cst_32 : f32 to vector<16x16xf32>
    %87 = vector.broadcast %cst_33 : f32 to vector<16x16xf32>
    %88 = arith.select %85, %86, %87 : vector<16x16xi1>, vector<16x16xf32>
    %cst_34 = arith.constant dense<0.000000e+00> : vector<16xf32>
    %89 = vector.multi_reduction <add>, %88, %cst_34 [1] : vector<16x16xf32> to vector<16xf32>
    %90 = vector.shape_cast %89 : vector<16xf32> to vector<16x1xf32>
    %cst_35 = arith.constant 4.000000e+00 : f32
    %91 = vector.broadcast %cst_35 : f32 to vector<16x1xf32>
    %92 = arith.cmpf olt, %90, %91 : vector<16x1xf32>
    %cst_36 = arith.constant 1.000000e+00 : f32
    %cst_37 = arith.constant 0.000000e+00 : f32
    %93 = vector.broadcast %cst_36 : f32 to vector<16x1xf32>
    %94 = vector.broadcast %cst_37 : f32 to vector<16x1xf32>
    %95 = arith.select %92, %93, %94 : vector<16x1xi1>, vector<16x1xf32>
    %96 = arith.mulf %95, %70 : vector<16x1xf32>
    %97 = vector.broadcast %96 : vector<16x1xf32> to vector<16x32xf32>
    %98 = arith.mulf %97, %68 : vector<16x32xf32>
    %cst_38 = arith.constant dense<0.000000e+00> : vector<2x32xf32>
    %99 = tpu.matmul %3, %98, %cst_38 {dimension_numbers = #tpu.dot_dimension_numbers<[1], [0], [0], [1], [0, 0, 1, 1], [], []>} : vector<2x16xf32>, vector<16x32xf32>, vector<2x32xf32> -> vector<2x32xf32>
    %cst_39 = arith.constant 2.500000e-01 : f32
    %100 = vector.broadcast %cst_39 : f32 to vector<2x32xf32>
    %101 = arith.mulf %99, %100 : vector<2x32xf32>
    %cst_40 = arith.constant dense<0.000000e+00> : vector<2x4xf32>
    %102 = tpu.matmul %101, %12, %cst_40 {dimension_numbers = #tpu.dot_dimension_numbers<[1], [0], [0], [1], [0, 0, 1, 1], [], []>} : vector<2x32xf32>, vector<32x4xf32>, vector<2x4xf32> -> vector<2x4xf32>
    %103 = vector.broadcast %13 : vector<1x4xf32> to vector<2x4xf32>
    %104 = arith.addf %102, %103 : vector<2x4xf32>
    %c0_41 = arith.constant 0 : index
    %c0_42 = arith.constant 0 : index
    %105 = vector.load %arg2[%c0_41, %c0_42] : memref<2x4xf32, #tpu.memory_space<vmem>>, vector<2x4xf32>
    tpu.vector_store %arg2[%c0_41, %c0_42], %104 {strides = array<i32>} : memref<2x4xf32, #tpu.memory_space<vmem>>, vector<2x4xf32>,
    return
  }
}

</mosaic_0001>

<bundles_post_ra>
// kernel: tpu_custom_call.1
= control target key start
LH: loop header
LB: loop body
LE: loop exit
PB: predicated region body
PF: predicated region fallthrough
CT: control target
= control target key end

     0   :  { %7 = vsyncpa [#allocation3], 0  ;;  %s1964_s0 = inlined_call_operand.vmem [shape: f32[16,8], index: 0, kind: input, shape index: {}]   ;;  %s1965_s1 = inlined_call_operand.hbm [shape: f32[208,128], index: 1, kind: input, shape index: {}]   ;;  %s1966_s2 = inlined_call_operand.hbm [shape: f32[2,4], index: 2, kind: output, shape index: {}]  }
   0x1   :  { %8 = vsyncpa [#allocation4], 0  ;;  %s1776_s9 = smov [#allocation2]   ;;  %s1728_s13 = scalar_lea.hbm %s1965_s1, 3328 }
   0x2   :  { %s16_s10 = sshll.u32 %s1776_s9, 4  ;;  %p1729_p0 = scmp.ne.s32.totalorder %s1965_s1, %s1728_s13  ;;  %s17_s10 = int_to_ptr.vmem [resolvable:$true] %s16_s10 }
   0x3   :  { %p1732_p1 = scmp.lt.u32.totalorder %s1728_s13, %s1965_s1 }
   0x5   :  { %p1734_p2 = pnand %p1732_p1, %p1729_p0 }
   0x7   :  { %1737 = shalt.err (!%p1734_p2)
}
   0x8   :  { %s1738_s18 = scalar_lea.vmem %s17_s10, 3328  ;;  %p1743_p4 = scmp.lt.s32.totalorder %s17_s10, %s17_s10 }
   0x9   :  { %p1739_p3 = scmp.ne.s32.totalorder %s17_s10, %s1738_s18  ;;  %p1744_p5 = scmp.lt.s32.totalorder %s1738_s18, %s1738_s18 }
   0xb   :  { %p1745_p6 = por %p1744_p5, %p1743_p4 }
   0xd   :  { %p1746_p7 = pnand %p1745_p6, %p1739_p3 }
   0xf   :  { %1749 = shalt.err (!%p1746_p7)
}
  0x10   :  { %s1777_s19 = smov 128   ;;  %s1778_s20 = smov 8  }
  0x11   :  { %22 = dma.hbm_to_vmem [thread:$0]  %s1965_s1, 3328, %s17_s10, [#allocation3], %s1777_s19, %s1777_s19, %s1778_s20  }
  0x12   :  { %1772 = dma.done.wait [#allocation3], 3328  }
  0x13   :  { %1773 = vsyncadd [#allocation3], 4294963968  ;;  %vm54_vm0 = vcmask 64512   ;;  %v35_v0 = vld [vmem:[#allocation2 + $0x38] sm:$0xff]  ;;  %v26_v1 = vld [vmem:[%s1964_s0] sm:$0xff]  ;;  %v243_v5 = vlaneseq  ;;  %vm378_vm4 = vcmask 130048  }
  0x14   :  { %v27_v2 = vld [vmem:[%s1964_s0 + $0x8] sm:$0xff]  ;;  %1544 = vmatprep.subr.mxu1 %v35_v0  ;;  %1546 = vmatprep.mubr.msk.f32.mxu1 %vm54_vm0, %v26_v1  ;;  %v34_v16 = vld [vmem:[#allocation2 + $0x30] sm:$0xff]  ;;  %v1779_v17 = vmov 1966171168   ;;  %v1841_v28 = vld [vmem:[#allocation2] sm:$0xff]  ;;  %vm844_vm12 = vcmask 261120  }
  0x15   :  { %1545 = vmatpush3.msra.mxu1 %v35_v0  ;;  %1541 = vmatprep.mubr.msk.f32.mxu0 %vm54_vm0, %v26_v1  ;;  %v1823_v6 = vshrl.u32 %v243_v5, 7  ;;  %v289_v18 = vunpack.c.l.s4 %v1779_v17  ;;  %vm364_vm1 = vcmp.gt.f32.partialorder %v1841_v28, 0.0  ;;  %v29_v36 = vld [vmem:[#allocation2 + $0x8] sm:$0xff]  ;;  %s1781_s0 = smov 96   ;;  %s1785_s1 = smov [#allocation5]  }
  0x16   :  { %1547 = vmatmul.mubr.msk.f32.vlgmr.msra.gmra.mrb[0].mxu1 %vm54_vm0, %v27_v2  ;;  %1539 = vmatprep.subr.mxu0 %v34_v16  ;;  %vm365_vm6 = vcmp.gt.f32.partialorder %v29_v36, 0.0  ;;  %s1453_s27 = sshll.u32 %s1785_s1, 4  ;;  %s1454_s27 = int_to_ptr.vmem [resolvable:$true] %s1453_s27 }
  0x17   :  { %v256_v7 = vsub.s32 5, %v1823_v6  ;;  %v245_v8 = vsub.s32 4, %v1823_v6  ;;  %v267_v12 = vsub.s32 6, %v1823_v6  ;;  %v278_v14 = vsub.s32 7, %v1823_v6  ;;  %1540 = vmatpush3.msra.mxu0 %v34_v16  ;;  %s1750_s28 = scalar_lea.vmem %s1454_s27, 32  ;;  %p1755_p9 = scmp.lt.s32.totalorder %s1454_s27, %s1454_s27 }
  0x18   :  { %1542 = vmatmul.mubr.msk.f32.vlgmr.msra.gmra.mrb[0].mxu0 %vm54_vm0, %v27_v2  ;;  %v290_v19 = vunpack.c.0.s8 %v289_v18  ;;  %v1836_v24 = vsub.s32 0, %v1823_v6  ;;  %p1751_p8 = scmp.ne.s32.totalorder %s1454_s27, %s1750_s28  ;;  %p1756_p10 = scmp.lt.s32.totalorder %s1750_s28, %s1750_s28 }
  0x1a   :  { %v1831_v20 = vsub.s32 %v290_v19, %v1823_v6  ;;  %p1757_p11 = por %p1756_p10, %p1755_p9 }
  0x1c   :  { %p1758_p12 = pnand %p1757_p11, %p1751_p8 }
  0xe9   :  { %v1548_v3 = vpop.f32.mrb[0].mxu1 }
  0xea   :  { %v202_v4 = vpop.f32.mrb[1].mxu1 }
  0xeb   :  { %211 = vxpose.xlu0.b32.start [1/2] (short) (narrow) %v202_v4, 8 }
  0xef   :  { %212 = vxpose.xlu0.b32.end [2/2] (short) (narrow) %v1548_v3, 8 }
 0x16b   :  { %v227_v9 = vpop.trf.xlu0 }
 0x16c   :  { %v257_v10 = vrot.slane %v227_v9, %v256_v7  ;;  %v246_v11 = vrot.slane %v227_v9, %v245_v8  ;;  %v268_v13 = vrot.slane %v227_v9, %v267_v12  ;;  %v279_v15 = vrot.slane %v227_v9, %v278_v14 }
 0x16d   :  { %v294_v21 = vrot.slane %v227_v9, %v1831_v20 }
 0x16e   :  { %259 = vbcast.lane.b32.xlu0 %v257_v10, 256  ;;  %248 = vbcast.lane.b32.xlu1 %v246_v11, 256 }
 0x16f   :  { %v295_v22 = vcombine.high %v294_v21, %v294_v21  ;;  %v302_v25 = vrot.slane %v294_v21, %v1831_v20 }
 0x171   :  { %v309_v23 = vrot.slane %v295_v22, %v1831_v20  ;;  %v315_v27 = vrot.slane %v302_v25, %v1836_v24  ;;  %v310_v41 = vcombine.high %v302_v25, %v302_v25 }
 0x172   :  { %252 = vbcast.lane.b32.xlu1 %v246_v11, 264 }
 0x173   :  { %v319_v26 = vrot.slane %v309_v23, %v1836_v24  ;;  %v323_v49 = vrot.slane %v310_v41, %v1836_v24  ;;  %v311_v59 = vcombine.high %v309_v23, %v309_v23 }
 0x175   :  { %v327_v2 = vrot.slane %v311_v59, %v1836_v24 }
 0x176   :  { %263 = vbcast.lane.b32.xlu1 %v257_v10, 264 }
 0x17a   :  { %270 = vbcast.lane.b32.xlu1 %v268_v13, 256 }
 0x17e   :  { %274 = vbcast.lane.b32.xlu1 %v268_v13, 264 }
 0x182   :  { %281 = vbcast.lane.b32.xlu1 %v279_v15, 256 }
 0x186   :  { %285 = vbcast.lane.b32.xlu1 %v279_v15, 264 }
 0x1e0   :  { %v260_v29 = vpop.permute.xlu0 %259  ;;  %v249_v30 = vpop.permute.xlu1 %248 }
 0x1e1   :  { %v334_v31 = vadd.f32 %v319_v26, %v260_v29  ;;  %v332_v32 = vadd.f32 %v315_v27, %v249_v30 }
 0x1e3   :  { %v350_v33 = vmul.f32 0.2, %v334_v31  ;;  %v348_v34 = vmul.f32 0.2, %v332_v32  ;;  %vm340_vm2 = vcmp.gt.f32.partialorder %v332_v32, 0.0  ;;  %vm342_vm3 = vcmp.gt.f32.partialorder %v334_v31, 0.0 }
 0x1e4   :  { %v253_v35 = vpop.permute.xlu1 %252 }
 0x1e5   :  { %v333_v37 = vadd.f32 %v315_v27, %v253_v35  ;;  %v356_v38 = vsel %vm340_vm2, %v332_v32, %v348_v34  ;;  %v358_v39 = vsel %vm342_vm3, %v334_v31, %v350_v33 }
 0x1e6   :  { %v370_v40 = vsel %vm364_vm1, %v356_v38, -1e+30  ;;  %v372_v45 = vsel %vm364_vm1, %v358_v39, -1e+30 }
 0x1e7   :  { %v349_v42 = vmul.f32 0.2, %v333_v37  ;;  %v379_v43 = vsel %vm378_vm4, %v370_v40, -inf  ;;  %vm341_vm5 = vcmp.gt.f32.partialorder %v333_v37, 0.0  ;;  %v385_v51 = vsel %vm378_vm4, %v372_v45, -inf }
 0x1e8   :  { %380 = vmax.xlane.f32.xlu1 %v379_v43  ;;  %v264_v44 = vpop.permute.xlu1 %263 }
 0x1e9   :  { %v335_v46 = vadd.f32 %v319_v26, %v264_v44  ;;  %v357_v47 = vsel %vm341_vm5, %v333_v37, %v349_v42 }
 0x1ea   :  { %v371_v48 = vsel %vm365_vm6, %v357_v47, -1e+30 }
 0x1eb   :  { %v351_v50 = vmul.f32 0.2, %v335_v46  ;;  %v382_v52 = vsel %vm378_vm4, %v371_v48, -inf  ;;  %vm343_vm7 = vcmp.gt.f32.partialorder %v335_v46, 0.0 }
 0x1ec   :  { %386 = vmax.xlane.f32.xlu1 %v385_v51  ;;  %383 = vmax.xlane.f32.xlu0 %v382_v52  ;;  %v271_v53 = vpop.permute.xlu1 %270 }
 0x1ed   :  { %v336_v54 = vadd.f32 %v323_v49, %v271_v53  ;;  %v359_v55 = vsel %vm343_vm7, %v335_v46, %v351_v50 }
 0x1ee   :  { %v373_v56 = vsel %vm365_vm6, %v359_v55, -1e+30 }
 0x1ef   :  { %v352_v57 = vmul.f32 0.2, %v336_v54  ;;  %v388_v58 = vsel %vm378_vm4, %v373_v56, -inf  ;;  %vm344_vm8 = vcmp.gt.f32.partialorder %v336_v54, 0.0 }
 0x1f0   :  { %389 = vmax.xlane.f32.xlu1 %v388_v58  ;;  %v275_v60 = vpop.permute.xlu1 %274 }
 0x1f1   :  { %v337_v61 = vadd.f32 %v323_v49, %v275_v60  ;;  %v360_v62 = vsel %vm344_vm8, %v336_v54, %v352_v57  ;;  %v1466_v60 = vld.sshfl [vmem:[#allocation2 + $0x28] sm:$0x33 pattern:$0x75316420] }
 0x1f2   :  { %v374_v63 = vsel %vm364_vm1, %v360_v62, -1e+30 }
 0x1f3   :  { %v353_v0 = vmul.f32 0.2, %v337_v61  ;;  %v391_v1 = vsel %vm378_vm4, %v374_v63, -inf  ;;  %vm345_vm9 = vcmp.gt.f32.partialorder %v337_v61, 0.0 }
 0x1f4   :  { %392 = vmax.xlane.f32.xlu1 %v391_v1  ;;  %v282_v3 = vpop.permute.xlu1 %281 }
 0x1f5   :  { %v338_v4 = vadd.f32 %v327_v2, %v282_v3  ;;  %v361_v7 = vsel %vm345_vm9, %v337_v61, %v353_v0  ;;  %v482_v61 = vrot.slane %v1466_v60, %v1831_v20  ;;  %v475_v0 = vcombine.high %v1466_v60, %v1466_v60 }
 0x1f6   :  { %v375_v8 = vsel %vm365_vm6, %v361_v7, -1e+30 }
 0x1f7   :  { %v354_v9 = vmul.f32 0.2, %v338_v4  ;;  %v394_v10 = vsel %vm378_vm4, %v375_v8, -inf  ;;  %vm346_vm10 = vcmp.gt.f32.partialorder %v338_v4, 0.0  ;;  %v495_v1 = vrot.slane %v482_v61, %v1836_v24 }
 0x1f8   :  { %395 = vmax.xlane.f32.xlu1 %v394_v10  ;;  %v286_v11 = vpop.permute.xlu1 %285 }
 0x1f9   :  { %v339_v12 = vadd.f32 %v327_v2, %v286_v11  ;;  %v362_v13 = vsel %vm346_vm10, %v338_v4, %v354_v9  ;;  %v489_v4 = vrot.slane %v475_v0, %v1831_v20 }
 0x1fa   :  { %v376_v14 = vsel %vm364_vm1, %v362_v13, -1e+30 }
 0x1fb   :  { %v355_v15 = vmul.f32 0.2, %v339_v12  ;;  %v397_v16 = vsel %vm378_vm4, %v376_v14, -inf  ;;  %vm347_vm11 = vcmp.gt.f32.partialorder %v339_v12, 0.0  ;;  %v499_v9 = vrot.slane %v489_v4, %v1836_v24 }
 0x1fc   :  { %398 = vmax.xlane.f32.xlu0 %v397_v16 }
 0x1fd   :  { %v363_v17 = vsel %vm347_vm11, %v339_v12, %v355_v15  ;;  %v491_v15 = vcombine.high %v489_v4, %v489_v4 }
 0x1fe   :  { %v377_v18 = vsel %vm365_vm6, %v363_v17, -1e+30 }
 0x1ff   :  { %v400_v19 = vsel %vm378_vm4, %v377_v18, -inf  ;;  %v507_v17 = vrot.slane %v491_v15, %v1836_v24 }
 0x200   :  { %401 = vmax.xlane.f32.xlu1 %v400_v19 }
 0x275   :  { %v381_v21 = vpop.xlane.xlu1 %380 }
 0x276   :  { %v403_v22 = vsub.f32 %v370_v40, %v381_v21 }
 0x278   :  { %v411_v23 = vmul.f32 1.442695, %v403_v22 }
 0x279   :  { %v384_v25 = vpop.xlane.xlu0 %383  ;;  %v387_v26 = vpop.xlane.xlu1 %386 }
 0x27a   :  { %1692 = vpow2.f32 %v411_v23  ;;  %v404_v27 = vsub.f32 %v371_v48, %v384_v25  ;;  %v405_v28 = vsub.f32 %v372_v45, %v387_v26 }
 0x27c   :  { %v413_v29 = vmul.f32 1.442695, %v404_v27  ;;  %v415_v30 = vmul.f32 1.442695, %v405_v28 }
 0x27d   :  { %v390_v31 = vpop.xlane.xlu1 %389 }
 0x27e   :  { %1694 = vpow2.f32 %v413_v29  ;;  %v406_v32 = vsub.f32 %v373_v56, %v390_v31 }
 0x27f   :  { %1696 = vpow2.f32 %v415_v30 }
 0x280   :  { %v417_v33 = vmul.f32 1.442695, %v406_v32 }
 0x281   :  { %v393_v34 = vpop.xlane.xlu1 %392 }
 0x282   :  { %1698 = vpow2.f32 %v417_v33  ;;  %v407_v35 = vsub.f32 %v374_v63, %v393_v34  ;;  %v1543_v63 = vpop.f32.mrb[0].mxu0 }
 0x283   :  { %v127_v3 = vpop.f32.mrb[1].mxu0  ;;  %v513_v7 = vmul.f32 %v1543_v63, %v495_v1  ;;  %v515_v11 = vmul.f32 %v1543_v63, %v499_v9  ;;  %v519_v20 = vmul.f32 %v1543_v63, %v507_v17 }
 0x284   :  { %v1866_v36 = vpop.eup %1692  ;;  %v419_v37 = vmul.f32 1.442695, %v407_v35  ;;  %v514_v12 = vmul.f32 %v499_v9, %v127_v3  ;;  %v518_v21 = vmul.f32 %v507_v17, %v127_v3 }
 0x285   :  { %v396_v38 = vpop.xlane.xlu1 %395  ;;  %v427_v39 = vsel %vm378_vm4, %v1866_v36, 0.0 }
 0x286   :  { %1700 = vpow2.f32 %v419_v37  ;;  %v408_v40 = vsub.f32 %v375_v8, %v396_v38  ;;  %428 = vadd.xlane.f32.xlu0 %v427_v39  ;;  %v512_v8 = vmul.f32 %v495_v1, %v127_v3  ;;  %v1635_v13 = vpack.c.bf16 %v515_v11, %v514_v12 }
 0x287   :  { %v1643_v23 = vpack.c.bf16 %v519_v20, %v518_v21  ;;  %v42_v21 = vld [vmem:[#allocation2 + $0x70] sm:$0xff] }
 0x288   :  { %v1870_v41 = vpop.eup %1694  ;;  %v421_v42 = vmul.f32 1.442695, %v408_v40  ;;  %v1631_v10 = vpack.c.bf16 %v513_v7, %v512_v8  ;;  %1636 = vmatprep.subr.bf16.mxu1 %v1635_v13 }
 0x289   :  { %v1872_v43 = vpop.eup %1696  ;;  %v399_v44 = vpop.xlane.xlu0 %398  ;;  %v430_v45 = vsel %vm378_vm4, %v1870_v41, 0.0  ;;  %1638 = vmatpush3.bf16.msra.mxu1 %v1635_v13 }
 0x28a   :  { %1702 = vpow2.f32 %v421_v42  ;;  %v409_v46 = vsub.f32 %v376_v14, %v399_v44  ;;  %431 = vadd.xlane.f32.xlu1 %v430_v45  ;;  %v433_v47 = vsel %vm378_vm4, %v1872_v43, 0.0  ;;  %1632 = vmatprep.subr.bf16.mxu0 %v1631_v10  ;;  %v490_v14 = vcombine.high %v482_v61, %v482_v61 }
 0x28b   :  { %434 = vadd.xlane.f32.xlu0 %v433_v47  ;;  %1634 = vmatpush3.bf16.msra.mxu0 %v1631_v10  ;;  %v1475_v10 = vld [vmem:[#allocation2 + $0x40] ss:$0 sm:$0xff] }
 0x28c   :  { %v1878_v48 = vpop.eup %1698  ;;  %v423_v49 = vmul.f32 1.442695, %v409_v46  ;;  %v503_v16 = vrot.slane %v490_v14, %v1836_v24  ;;  %1644 = vmatprep.subr.bf16.mxu1 %v1643_v23 }
 0x28d   :  { %v402_v50 = vpop.xlane.xlu1 %401  ;;  %v436_v51 = vsel %vm378_vm4, %v1878_v48, 0.0 }
 0x28e   :  { %1704 = vpow2.f32 %v423_v49  ;;  %v410_v52 = vsub.f32 %v377_v18, %v402_v50  ;;  %437 = vadd.xlane.f32.xlu1 %v436_v51  ;;  %v517_v18 = vmul.f32 %v1543_v63, %v503_v16  ;;  %v516_v19 = vmul.f32 %v503_v16, %v127_v3  ;;  %v37_v49 = vld [vmem:[#allocation2 + $0x48] sm:$0xff]  ;;  %v38_v50 = vld [vmem:[#allocation2 + $0x50] sm:$0xff] }
 0x28f   :  { %v1647_v51 = vpack.c.bf16 %v38_v50, %v37_v49 }
 0x290   :  { %v1882_v53 = vpop.eup %1700  ;;  %v425_v54 = vmul.f32 1.442695, %v410_v52  ;;  %v1639_v22 = vpack.c.bf16 %v517_v18, %v516_v19  ;;  %v39_v52 = vld [vmem:[#allocation2 + $0x58] sm:$0xff]  ;;  %v30_v19 = vld [vmem:[#allocation2 + $0x10] sm:$0xff] }
 0x291   :  { %v439_v55 = vsel %vm378_vm4, %v1882_v53, 0.0 }
 0x292   :  { %1706 = vpow2.f32 %v425_v54  ;;  %440 = vadd.xlane.f32.xlu0 %v439_v55  ;;  %1640 = vmatprep.subr.bf16.mxu0 %v1639_v22 }
 0x294   :  { %v1886_v56 = vpop.eup %1702 }
 0x295   :  { %v442_v57 = vsel %vm378_vm4, %v1886_v56, 0.0 }
 0x296   :  { %443 = vadd.xlane.f32.xlu1 %v442_v57 }
 0x298   :  { %v1890_v58 = vpop.eup %1704 }
 0x299   :  { %v445_v59 = vsel %vm378_vm4, %v1890_v58, 0.0 }
 0x29a   :  { %446 = vadd.xlane.f32.xlu0 %v445_v59 }
 0x29c   :  { %v1895_v62 = vpop.eup %1706 }
 0x29d   :  { %v448_v2 = vsel %vm378_vm4, %v1895_v62, 0.0 }
 0x29e   :  { %449 = vadd.xlane.f32.xlu1 %v448_v2 }
 0x313   :  { %v429_v25 = vpop.xlane.xlu0 %428 }
 0x314   :  { %1708 = vrcp.f32 %v429_v25 }
 0x317   :  { %v432_v26 = vpop.xlane.xlu1 %431 }
 0x318   :  { %v435_v27 = vpop.xlane.xlu0 %434  ;;  %1710 = vrcp.f32 %v432_v26 }
 0x319   :  { %1712 = vrcp.f32 %v435_v27 }
 0x31b   :  { %v438_v28 = vpop.xlane.xlu1 %437 }
 0x31c   :  { %1714 = vrcp.f32 %v438_v28  ;;  %v31_v28 = vld [vmem:[#allocation2 + $0x18] sm:$0xff] }
 0x31e   :  { %v1709_v29 = vpop.eup %1708 }
 0x31f   :  { %v441_v30 = vpop.xlane.xlu0 %440  ;;  %v459_v31 = vmul.f32 %v1709_v29, %v1866_v36  ;;  %v44_v29 = vld [vmem:[#allocation2 + $0x80] sm:$0xff] }
 0x320   :  { %1716 = vrcp.f32 %v441_v30  ;;  %v45_v30 = vld [vmem:[#allocation2 + $0x88] sm:$0xff] }
 0x321   :  { %1553 = vmatprep.mubr.msk.f32.mxu0 %vm378_vm4, %v459_v31  ;;  %v1663_v31 = vpack.c.bf16 %v45_v30, %v44_v29 }
 0x322   :  { %v1711_v32 = vpop.eup %1710 }
 0x323   :  { %v1713_v33 = vpop.eup %1712  ;;  %v460_v34 = vmul.f32 %v1711_v32, %v1870_v41  ;;  %v444_v35 = vpop.xlane.xlu1 %443  ;;  %v1478_v32 = vld [vmem:[#allocation2 + $0x68] ss:$0 sm:$0xff] }
 0x324   :  { %1718 = vrcp.f32 %v444_v35  ;;  %v461_v37 = vmul.f32 %v1713_v33, %v1872_v43 }
 0x325   :  { %1554 = vmatmul.mubr.msk.f32.vlgmr.msra.gmra.mrb[2].mxu0 %vm378_vm4, %v460_v34 }
 0x326   :  { %v1715_v38 = vpop.eup %1714  ;;  %1560 = vmatprep.mubr.msk.f32.mxu1 %vm378_vm4, %v461_v37  ;;  %1642 = vmatpush3.bf16.msra.mxu0 %v1639_v22  ;;  %v43_v22 = vld [vmem:[#allocation2 + $0x78] sm:$0xff] }
 0x327   :  { %v462_v39 = vmul.f32 %v1715_v38, %v1878_v48  ;;  %v447_v36 = vpop.xlane.xlu0 %446  ;;  %1648 = vmatprep.subr.bf16.mxu0 %v1647_v51  ;;  %v1659_v27 = vpack.c.bf16 %v43_v22, %v42_v21  ;;  %v1487_v22 = vld [vmem:[#allocation2 + $0xb8] ss:$0 sm:$0xff] }
 0x328   :  { %1720 = vrcp.f32 %v447_v36 }
 0x329   :  { %1561 = vmatmul.mubr.msk.f32.vlgmr.msra.gmra.mrb[2].mxu1 %vm378_vm4, %v462_v39 }
 0x32a   :  { %v1717_v40 = vpop.eup %1716  ;;  %1646 = vmatpush3.bf16.msra.mxu1 %v1643_v23 }
 0x32b   :  { %v450_v42 = vpop.xlane.xlu1 %449  ;;  %v463_v41 = vmul.f32 %v1717_v40, %v1882_v53  ;;  %v40_v53 = vld [vmem:[#allocation2 + $0x60] sm:$0xff] }
 0x32c   :  { %1722 = vrcp.f32 %v450_v42  ;;  %v1651_v54 = vpack.c.bf16 %v40_v53, %v39_v52  ;;  %v1238_v53 = vand.u32 127, %v243_v5  ;;  %v1782_v5 = vmov 0.0  }
 0x32d   :  { %1567 = vmatprep.mubr.msk.f32.mxu0 %vm378_vm4, %v463_v41  ;;  %v1780_v41 = vmov 32  }
 0x32e   :  { %v1719_v43 = vpop.eup %1718  ;;  %1690 = vset.pattern.permute.xlu1 %v1780_v41  ;;  %vm1258_vm3 = vcmp.lt.s32.totalorder %v1238_v53, %v1823_v6 }
 0x32f   :  { %v464_v44 = vmul.f32 %v1719_v43, %v1886_v56  ;;  %v1483_v43 = vld [vmem:[#allocation2 + $0x90] ss:$0 sm:$0xff] }
 0x331   :  { %1568 = vmatmul.mubr.msk.f32.vlgmr.msra.gmra.mrb[4].mxu0 %vm378_vm4, %v464_v44 }
 0x332   :  { %v1721_v45 = vpop.eup %1720  ;;  %1650 = vmatpush3.bf16.msra.mxu0 %v1647_v51 }
 0x333   :  { %v465_v46 = vmul.f32 %v1721_v45, %v1890_v58  ;;  %1652 = vmatprep.subr.bf16.mxu0 %v1651_v54 }
 0x335   :  { %1574 = vmatprep.mubr.msk.f32.mxu1 %vm378_vm4, %v465_v46 }
 0x336   :  { %v1723_v47 = vpop.eup %1722  ;;  %1654 = vmatpush3.bf16.msra.mxu0 %v1651_v54  ;;  %v1241_v54 = vadd.s32 8, %v1823_v6 }
 0x337   :  { %v466_v48 = vmul.f32 %v1723_v47, %v1895_v62 }
 0x338   :  { %vm1259_vm13 = vcmp.lt.s32.totalorder %v1238_v53, %v1241_v54 }
 0x339   :  { %1575 = vmatmul.mubr.msk.f32.vlgmr.msra.gmra.mrb[4].mxu1 %vm378_vm4, %v466_v48 }
 0x33a   :  { %1592 = vmatprep.mubr.msk.f32.mxu1 %vm378_vm4, %v30_v19 }
 0x3f8   :  { %v1555_v55 = vpop.f32.mrb[2].mxu0 }
 0x3f9   :  { %v592_v56 = vpop.f32.mrb[3].mxu0  ;;  %v852_v58 = vsel %vm844_vm12, %v1555_v55, 0.0 }
 0x3fa   :  { %v845_v61 = vsel %vm844_vm12, %v592_v56, 0.0  ;;  %v53_v56 = vld [vmem:[#allocation2 + $0xc8] sm:$0xff] }
 0x3fb   :  { %vm1265_vm0 = vcmp.gt.f32.partialorder %v53_v56, 0.0 }
 0x3fc   :  { %v1562_v57 = vpop.f32.mrb[2].mxu1 }
 0x3fd   :  { %v853_v59 = vsel %vm844_vm12, %v1562_v57, 0.0  ;;  %v673_v60 = vpop.f32.mrb[3].mxu1 }
 0x3fe   :  { %v854_v62 = vadd.f32 %v853_v59, %v852_v58  ;;  %v846_v63 = vsel %vm844_vm12, %v673_v60, 0.0  ;;  %v52_v59 = vld [vmem:[#allocation2 + $0xc0] sm:$0xff] }
 0x3ff   :  { %v847_v0 = vadd.f32 %v846_v63, %v845_v61  ;;  %vm1264_vm8 = vcmp.gt.f32.partialorder %v52_v59, 0.0 }
 0x404   :  { %v1569_v1 = vpop.f32.mrb[4].mxu0 }
 0x405   :  { %v855_v2 = vsel %vm844_vm12, %v1569_v1, 0.0  ;;  %v754_v3 = vpop.f32.mrb[5].mxu0 }
 0x406   :  { %v856_v4 = vadd.f32 %v855_v2, %v854_v62  ;;  %v848_v7 = vsel %vm844_vm12, %v754_v3, 0.0 }
 0x407   :  { %v849_v8 = vadd.f32 %v848_v7, %v847_v0  ;;  %v47_v7 = vld [vmem:[#allocation2 + $0x98] sm:$0xff] }
 0x40c   :  { %v1576_v9 = vpop.f32.mrb[4].mxu1 }
 0x40d   :  { %v857_v11 = vsel %vm844_vm12, %v1576_v9, 0.0  ;;  %v835_v12 = vpop.f32.mrb[5].mxu1 }
 0x40e   :  { %v858_v13 = vadd.f32 %v857_v11, %v856_v4  ;;  %v850_v14 = vsel %vm844_vm12, %v835_v12, 0.0  ;;  %v1783_v4 = vmov 0.0|0.0  }
 0x40f   :  { %v851_v15 = vadd.f32 %v850_v14, %v849_v8  ;;  %v48_v8 = vld [vmem:[#allocation2 + $0xa0] sm:$0xff] }
 0x410   :  { %v864_v16 = vadd.f32 %v1475_v10, %v858_v13  ;;  %v1675_v9 = vpack.c.bf16 %v48_v8, %v47_v7 }
 0x411   :  { %v863_v17 = vadd.f32 %v1475_v10, %v851_v15  ;;  %v32_v15 = vld [vmem:[#allocation2 + $0x20] sm:$0x3] }
 0x412   :  { %v866_v20 = vmax.f32 %v864_v16, 0.0  ;;  %v49_v16 = vld [vmem:[#allocation2 + $0xa8] sm:$0xff] }
 0x413   :  { %v865_v18 = vmax.f32 %v863_v17, 0.0  ;;  %v50_v17 = vld [vmem:[#allocation2 + $0xb0] sm:$0xff] }
 0x415   :  { %1585 = vmatprep.mubr.msk.f32.mxu0 %vm844_vm12, %v865_v18  ;;  %v1678_v18 = vpack.c.bf16 %v50_v17, %v49_v16 }
 0x416   :  { %1586 = vmatmul.mubr.msk.f32.vlgmr.msra.gmra.mrb[6].mxu0 %vm844_vm12, %v866_v20 }
 0x417   :  { %1610 = vmatprep.mubr.msk.f32.mxu0 %vm378_vm4, %v30_v19 }
 0x4e9   :  { %v1587_v23 = vpop.f32.mrb[6].mxu0 }
 0x4ea   :  { %v939_v25 = vpop.f32.mrb[7].mxu0 }
 0x4eb   :  { %v1655_v26 = vpack.c.bf16 %v1587_v23, %v939_v25 }
 0x4ed   :  { %1656 = vmatprep.subr.bf16.mxu1 %v1655_v26 }
 0x4ee   :  { %1658 = vmatpush3.bf16.msra.mxu1 %v1655_v26 }
 0x4ef   :  { %1660 = vmatprep.subr.bf16.mxu1 %v1659_v27 }
 0x4f1   :  { %1593 = vmatmul.mubr.msk.f32.vlgmr.msra.gmra.mrb[6].mxu1 %vm378_vm4, %v31_v28 }
 0x4f2   :  { %1662 = vmatpush3.bf16.msra.mxu1 %v1659_v27 }
 0x4f3   :  { %1664 = vmatprep.subr.bf16.mxu1 %v1663_v31 }
 0x4f6   :  { %1666 = vmatpush3.bf16.msra.mxu1 %v1663_v31 }
 0x4f7   :  { %1674 = vmatprep.subr.bf16.mxu1 %v1783_v4 }
 0x5c4   :  { %v1594_v33 = vpop.f32.mrb[6].mxu1 }
 0x5c5   :  { %v1030_v34 = vadd.f32 %v1594_v33, %v1478_v32  ;;  %v1024_v35 = vpop.f32.mrb[7].mxu1 }
 0x5c6   :  { %v1025_v37 = vadd.f32 %v1478_v32, %v1024_v35 }
 0x5c7   :  { %v1034_v39 = vmax.f32 %v1030_v34, 0.0 }
 0x5c8   :  { %v1033_v38 = vmax.f32 %v1025_v37, 0.0 }
 0x5ca   :  { %1603 = vmatprep.mubr.msk.f32.mxu1 %vm844_vm12, %v1033_v38 }
 0x5cb   :  { %1604 = vmatmul.mubr.msk.f32.vlgmr.msra.gmra.mrb[8].mxu1 %vm844_vm12, %v1034_v39 }
 0x5cc   :  { %1676 = vmatpush3.bf16.msra.mxu1 %v1675_v9 }
 0x5cd   :  { %1677 = vmatprep.subr.bf16.mxu1 %v1783_v4 }
 0x5d0   :  { %1679 = vmatpush3.bf16.msra.mxu1 %v1678_v18 }
 0x69e   :  { %v1605_v36 = vpop.f32.mrb[8].mxu1 }
 0x69f   :  { %v1107_v40 = vpop.f32.mrb[9].mxu1 }
 0x6a0   :  { %v1667_v42 = vpack.c.bf16 %v1605_v36, %v1107_v40 }
 0x6a2   :  { %1668 = vmatprep.subr.bf16.mxu0 %v1667_v42 }
 0x6a3   :  { %1670 = vmatpush3.bf16.msra.mxu0 %v1667_v42 }
 0x6a4   :  { %1671 = vmatprep.subr.bf16.mxu0 %v1783_v4 }
 0x6a6   :  { %1611 = vmatmul.mubr.msk.f32.vlgmr.msra.gmra.mrb[8].mxu0 %vm378_vm4, %v31_v28 }
 0x779   :  { %v1612_v44 = vpop.f32.mrb[8].mxu0 }
 0x77a   :  { %v1936_v45 = vadd.f32 %v1612_v44, %v1483_v43  ;;  %v1186_v46 = vpop.f32.mrb[9].mxu0 }
 0x77b   :  { %v1938_v47 = vadd.f32 %v1483_v43, %v1186_v46 }
 0x77c   :  { %1724 = vtanh.f32 %v1936_v45 }
 0x77d   :  { %1726 = vtanh.f32 %v1938_v47 }
 0x786   :  { %v1725_v48 = vpop.eup %1724 }
 0x787   :  { %v1727_v49 = vpop.eup %1726  ;;  %1201 = vrot.lane.b32.xlu1 %v1725_v48, %s1781_s0 }
 0x788   :  { %1199 = vrot.lane.b32.xlu0 %v1727_v49, %s1781_s0 }
 0x78b   :  { %1247 = vperm.xlu1 %1690, %v1727_v49  }
 0x78f   :  { %1251 = vperm.xlu1 %1690, %v1725_v48  }
 0x7f9   :  { %v1202_v51 = vpop.permute.xlu1 %1201 }
 0x7fa   :  { %v1200_v50 = vpop.permute.xlu0 %1199 }
 0x7fb   :  { %1205 = vxpose.xlu0.b32.start [1/2] (short) (narrow) %v1200_v50, 8 }
 0x7ff   :  { %1206 = vxpose.xlu0.b32.end [2/2] (short) (narrow) %v1202_v51, 8 }
 0x80a   :  { %v1248_v52 = vpop.permute.xlu1 %1247 }
 0x80e   :  { %v1252_v58 = vpop.permute.xlu1 %1251 }
 0x828   :  { %1691 = vset.pattern.permute.xlu0 %v1780_v41 }
 0x87b   :  { %v1221_v55 = vpop.trf.xlu0 }
 0x87c   :  { %v1245_v57 = vrot.slane %v1221_v55, %v1836_v24 }
 0x87e   :  { %vm1255_vm14 = vcmp.gt.f32.partialorder %v1245_v57, %v1252_v58  ;;  %vm1257_vm15 = vcmp.eq.f32.partialorder %v1245_v57, %v1252_v58  ;;  %vm1256_vm2 = vcmp.eq.f32.partialorder %v1245_v57, %v1248_v52  ;;  %vm1254_vm6 = vcmp.gt.f32.partialorder %v1245_v57, %v1248_v52 }
 0x87f   :  { %vm1261_vm1 = vmand %vm1257_vm15, %vm1259_vm13 }
 0x880   :  { %vm1263_vm5 = vmor %vm1255_vm14, %vm1261_vm1  ;;  %vm1784_vm14 = vmmov 0  }
 0x881   :  { %vm1267_vm7 = vmand %vm1263_vm5, %vm1265_vm0  ;;  %1617 = vmatprep.mubr.msk.f32.mxu0 %vm1784_vm14, %v1782_v5  ;;  %1628 = vmatprep.mubr.msk.f32.mxu1 %vm1784_vm14, %v1782_v5  ;;  %vm1445_vm0 = vcmask 25600  }
 0x882   :  { %v1269_v60 = vsel %vm1267_vm7, 1.0, %v1782_v5  ;;  %vm1260_vm9 = vmand %vm1256_vm2, %vm1258_vm3 }
 0x883   :  { %v1273_v61 = vsel %vm378_vm4, %v1269_v60, 0.0  ;;  %vm1262_vm10 = vmor %vm1254_vm6, %vm1260_vm9 }
 0x884   :  { %1274 = vadd.xlane.f32.xlu0 %v1273_v61  ;;  %vm1266_vm11 = vmand %vm1262_vm10, %vm1264_vm8 }
 0x885   :  { %v1268_v24 = vsel %vm1266_vm11, 1.0, %v1782_v5 }
 0x886   :  { %v1270_v62 = vsel %vm378_vm4, %v1268_v24, 0.0 }
 0x887   :  { %1271 = vadd.xlane.f32.xlu1 %v1270_v62 }
 0x911   :  { %v1275_v63 = vpop.xlane.xlu0 %1274 }
 0x912   :  { %vm1277_vm13 = vcmp.lt.f32.partialorder %v1275_v63, 4.0 }
 0x913   :  { %v1279_v2 = vsel %vm1277_vm13, 1.0, %v1782_v5 }
 0x914   :  { %v1272_v0 = vpop.xlane.xlu1 %1271  ;;  %v1281_v3 = vmul.f32 %v1725_v48, %v1279_v2 }
 0x915   :  { %vm1276_vm15 = vcmp.lt.f32.partialorder %v1272_v0, 4.0 }
 0x916   :  { %v1278_v6 = vsel %vm1276_vm15, 1.0, %v1782_v5 }
 0x917   :  { %v1280_v1 = vmul.f32 %v1727_v49, %v1278_v6 }
 0x919   :  { %1284 = vperm.xlu1 %1690, %v1280_v1  }
 0x91d   :  { %1289 = vperm.xlu1 %1690, %v1281_v3  }
 0x998   :  { %v1285_v10 = vpop.permute.xlu1 %1284 }
 0x999   :  { %v1292_v12 = vmul.f32 %v1285_v10, %v1938_v47 }
 0x99c   :  { %v1290_v11 = vpop.permute.xlu1 %1289 }
 0x99d   :  { %v1293_v13 = vmul.f32 %v1290_v11, %v1936_v45 }
 0x99f   :  { %v1672_v14 = vpack.c.bf16 %v1293_v13, %v1292_v12 }
 0x9a1   :  { %1673 = vmatpush3.bf16.msra.mxu0 %v1672_v14 }
 0x9a4   :  { %1618 = vmatmul.mubr.msk.f32.vlgmr.msra.gmra.mrb[10].mxu0 %vm378_vm4, %v32_v15 }
 0xa77   :  { %v1363_v20 = vpop.f32.mrb[10].mxu0 }
 0xa78   :  { %v1367_v19 = vmul.f32 0.25, %v1363_v20  ;;  %v1619_v21 = vpop.f32.mrb[11].mxu0 }
 0xa7a   :  { %1629 = vmatmul.mubr.msk.f32.vlgmr.msra.gmra.mrb[10].mxu1 %vm844_vm12, %v1367_v19 }
 0xb4d   :  { %v1441_v23 = vpop.f32.mrb[10].mxu1 }
 0xb4e   :  { %v1442_v25 = vadd.f32 %v1487_v22, %v1441_v23  ;;  %v1630_v26 = vpop.f32.mrb[11].mxu1 }
 0xb50   :  { %1446 = vst.msk [vmem:[#allocation5] sm:$0x3] %vm1445_vm0, %v1442_v25 }
 0xb51   :  { %1761 = shalt.err (!%p1758_p12)
}
 0xb52   :  { %s1762_s3 = scalar_lea.hbm %s1966_s2, 32 }
 0xb53   :  { %p1763_p13 = scmp.ne.s32.totalorder %s1966_s2, %s1762_s3  ;;  %p1766_p0 = scmp.lt.u32.totalorder %s1762_s3, %s1966_s2 }
 0xb55   :  { %p1768_p1 = pnand %p1766_p0, %p1763_p13 }
 0xb57   :  { %1771 = shalt.err (!%p1768_p1)
}
 0xb58   :  { %1456 = dma.vmem_to_hbm [thread:$0]  %s1454_s27, 32, %s1966_s2, [#allocation4]  }
 0xb59   :  { %1774 = dma.done.wait [#allocation4], 32  }
 0xb5a   :  { %1775 = vsyncadd [#allocation4], 4294967264 }
 0xb5b   :  { %1460 = vsyncpa [#allocation3], 1 }
 0xb5c   :  { %1461 = vsyncpa [#allocation4], 1 }

</bundles_post_ra>
